<compile_context>
chip_gen: v7x
topology: tpu7x:2x2x1
jax: 0.10.0
libtpu: 0.0.40
codegen_flags: <defaults>
</compile_context>

<pallas_src>
import jax
import jax.numpy as jnp
from jax.experimental import pallas as pl
from jax.experimental.pallas import tpu as pltpu

# ---------------- problem sizes (small, consistent with the module) -------------
B = 8      # batch  (for real workloads use batch >= 128 per call to engage the MXU)
D = 32     # flow dimension (dim)
H = 32     # hidden width of the coupling MLP
L = 4      # number of chained bijectors (len(blocks))
DH = D // 2


# ------------------------------- Pallas kernel ----------------------------------
def flow_chain_kernel(z_ref, w1_ref, b1_ref, w2s_ref, b2s_ref, w2t_ref, b2t_ref,
                      z_out_ref, logdet_ref):
    """Whole bijector chain in one invocation; all operands are VMEM-resident."""
    # One-time boundary split of the carry into halves; the per-layer half-swap
    # permutation is just a Python variable swap (no per-layer lane slicing).
    a = z_ref[:, :DH]                    # conditioning half  (z1), (B, DH)
    b = z_ref[:, DH:]                    # transformed half   (z2), (B, DH)

    log_dets = []
    for l in range(L):                   # static, fully unrolled layer loop
        w1 = w1_ref[l]                   # (DH, H)
        b1 = b1_ref[l]                   # (1, H)
        w2s = w2s_ref[l]                 # (H, DH)
        b2s = b2s_ref[l]                 # (1, DH)
        w2t = w2t_ref[l]                 # (H, DH)
        b2t = b2t_ref[l]                 # (1, DH)

        # Coupling MLP (MXU matmuls, f32 accumulation); s and t from separate matmuls.
        h = jnp.tanh(jnp.dot(a, w1, preferred_element_type=jnp.float32) + b1)   # (B, H)
        s = jnp.tanh(jnp.dot(h, w2s, preferred_element_type=jnp.float32) + b2s) # (B, DH)
        t = jnp.dot(h, w2t, preferred_element_type=jnp.float32) + b2t           # (B, DH)

        # Inverse (normalizing direction) of the affine coupling.
        b_new = (b - t) * jnp.exp(-s)                                            # (B, DH)

        # Per-sample log|det J| of this bijector.
        log_dets.append(-jnp.sum(s, axis=-1))                                    # (B,)

        # Half-swap permutation: next layer conditions on the newly transformed half.
        a, b = b_new, a

    # Single writeback of the final z and the full (L, B) log-det block.
    z_out_ref[...] = jnp.concatenate([a, b], axis=-1)                            # (B, D)
    logdet_ref[...] = jnp.stack(log_dets, axis=0)                                # (L, B)


@jax.jit
def normalizing_flow_forward(z, w1, b1, w2, b2):
    """Equivalent of NormalizingFlow.forward(z) -> (z, log_abs_det stack (L, B))."""
    # Host-side (XLA preamble) weight plumbing: split W2/b2 once into the s- and
    # t-producing columns so the kernel never lane-slices per layer.
    w2s, w2t = w2[:, :, :DH], w2[:, :, DH:]                     # (L, H, DH) each
    b2s, b2t = b2[:, :, :DH], b2[:, :, DH:]                     # (L, 1, DH) each

    vmem = pl.BlockSpec(memory_space=pltpu.MemorySpace.VMEM)    # whole array, VMEM-resident
    z_out, log_det = pl.pallas_call(
        flow_chain_kernel,
        out_shape=(
            jax.ShapeDtypeStruct((B, D), jnp.float32),
            jax.ShapeDtypeStruct((L, B), jnp.float32),
        ),
        in_specs=[vmem] * 7,
        out_specs=(vmem, vmem),
    )(z, w1, b1, w2s, b2s, w2t, b2t)

    # Row i of log_det is the per-sample log|det J| of bijector i.
    return z_out, log_det


# ------------------------- pure-JAX reference (for checking) --------------------
def reference_forward(z, w1, b1, w2, b2):
    log_dets = []
    for l in range(L):
        z1, z2 = z[:, :DH], z[:, DH:]
        h = jnp.tanh(z1 @ w1[l] + b1[l])
        st = h @ w2[l] + b2[l]
        s = jnp.tanh(st[:, :DH])
        t = st[:, DH:]
        z2n = (z2 - t) * jnp.exp(-s)
        z = jnp.concatenate([z2n, z1], axis=-1)
        log_dets.append(-jnp.sum(s, axis=-1))
    return z, log_dets


# ------------------------------------ main ---------------------------------------
if __name__ == "__main__":
    key = jax.random.PRNGKey(0)
    kz, k1, k2, k3, k4 = jax.random.split(key, 5)

    # Deterministic synthetic parameters for the L coupling bijectors.
    w1 = 0.1 * jax.random.normal(k1, (L, DH, H), dtype=jnp.float32)
    b1 = 0.1 * jax.random.normal(k2, (L, 1, H), dtype=jnp.float32)
    w2 = 0.1 * jax.random.normal(k3, (L, H, D), dtype=jnp.float32)
    b2 = 0.1 * jax.random.normal(k4, (L, 1, D), dtype=jnp.float32)

    # Input z (e.g. a sample from the base distribution).
    z = jax.random.normal(kz, (B, D), dtype=jnp.float32)

    z_out, log_det = normalizing_flow_forward(z, w1, b1, w2, b2)
    jax.block_until_ready((z_out, log_det))

    # Correctness check against the pure-JAX reference.
    z_ref, ld_ref = reference_forward(z, w1, b1, w2, b2)
    assert jnp.allclose(z_out, z_ref, atol=1e-5, rtol=1e-5), "z mismatch"
    assert jnp.allclose(log_det, jnp.stack(ld_ref, axis=0), atol=1e-5, rtol=1e-5), \
        "log_det mismatch"

    # TODO(synk): base_distribution.sample / .log_prob (used only by .sample())
    # is a host-side distribution object and is not part of this forward kernel.
    print("KERNEL_OK")
</pallas_src>

<mosaic_0001>
module attributes {stable_mosaic.version = 11 : i64} {
  func.func @flow_chain_kernel(%arg0: memref<8x32xf32, #tpu.memory_space<vmem>>, %arg1: memref<4x16x32xf32, #tpu.memory_space<vmem>>, %arg2: memref<4x1x32xf32, #tpu.memory_space<vmem>>, %arg3: memref<4x32x16xf32, #tpu.memory_space<vmem>>, %arg4: memref<4x1x16xf32, #tpu.memory_space<vmem>>, %arg5: memref<4x32x16xf32, #tpu.memory_space<vmem>>, %arg6: memref<4x1x16xf32, #tpu.memory_space<vmem>>, %arg7: memref<8x32xf32, #tpu.memory_space<vmem>>, %arg8: memref<4x8xf32, #tpu.memory_space<vmem>>) attributes {dimension_semantics = [], scalar_prefetch = 0 : i64, scratch_operands = 0 : i64, tpu.core_type = #tpu.core_type<tc>} {
    %c0 = arith.constant 0 : index
    %c0_0 = arith.constant 0 : index
    %0 = vector.load %arg0[%c0, %c0_0] : memref<8x32xf32, #tpu.memory_space<vmem>>, vector<8x16xf32>
    %c0_1 = arith.constant 0 : index
    %c16 = arith.constant 16 : index
    %1 = vector.load %arg0[%c0_1, %c16] : memref<8x32xf32, #tpu.memory_space<vmem>>, vector<8x16xf32>
    %c0_2 = arith.constant 0 : index
    %c0_3 = arith.constant 0 : index
    %c0_4 = arith.constant 0 : index
    %2 = vector.load %arg1[%c0_2, %c0_3, %c0_4] : memref<4x16x32xf32, #tpu.memory_space<vmem>>, vector<1x16x32xf32>
    %3 = vector.shape_cast %2 : vector<1x16x32xf32> to vector<16x32xf32>
    %c0_5 = arith.constant 0 : index
    %c0_6 = arith.constant 0 : index
    %c0_7 = arith.constant 0 : index
    %4 = vector.load %arg2[%c0_5, %c0_6, %c0_7] : memref<4x1x32xf32, #tpu.memory_space<vmem>>, vector<1x1x32xf32>
    %5 = vector.shape_cast %4 : vector<1x1x32xf32> to vector<1x32xf32>
    %c0_8 = arith.constant 0 : index
    %c0_9 = arith.constant 0 : index
    %c0_10 = arith.constant 0 : index
    %6 = vector.load %arg3[%c0_8, %c0_9, %c0_10] : memref<4x32x16xf32, #tpu.memory_space<vmem>>, vector<1x32x16xf32>
    %7 = vector.shape_cast %6 : vector<1x32x16xf32> to vector<32x16xf32>
    %c0_11 = arith.constant 0 : index
    %c0_12 = arith.constant 0 : index
    %c0_13 = arith.constant 0 : index
    %8 = vector.load %arg4[%c0_11, %c0_12, %c0_13] : memref<4x1x16xf32, #tpu.memory_space<vmem>>, vector<1x1x16xf32>
    %9 = vector.shape_cast %8 : vector<1x1x16xf32> to vector<1x16xf32>
    %c0_14 = arith.constant 0 : index
    %c0_15 = arith.constant 0 : index
    %c0_16 = arith.constant 0 : index
    %10 = vector.load %arg5[%c0_14, %c0_15, %c0_16] : memref<4x32x16xf32, #tpu.memory_space<vmem>>, vector<1x32x16xf32>
    %11 = vector.shape_cast %10 : vector<1x32x16xf32> to vector<32x16xf32>
    %c0_17 = arith.constant 0 : index
    %c0_18 = arith.constant 0 : index
    %c0_19 = arith.constant 0 : index
    %12 = vector.load %arg6[%c0_17, %c0_18, %c0_19] : memref<4x1x16xf32, #tpu.memory_space<vmem>>, vector<1x1x16xf32>
    %13 = vector.shape_cast %12 : vector<1x1x16xf32> to vector<1x16xf32>
    %cst = arith.constant dense<0.000000e+00> : vector<8x32xf32>
    %14 = tpu.matmul %0, %3, %cst {dimension_numbers = #tpu.dot_dimension_numbers<[1], [0], [0], [1], [0, 0, 1, 1], [], []>} : vector<8x16xf32>, vector<16x32xf32>, vector<8x32xf32> -> vector<8x32xf32>
    %15 = vector.broadcast %5 : vector<1x32xf32> to vector<8x32xf32>
    %16 = arith.addf %14, %15 : vector<8x32xf32>
    %17 = math.tanh %16 : vector<8x32xf32>
    %cst_20 = arith.constant dense<0.000000e+00> : vector<8x16xf32>
    %18 = tpu.matmul %17, %7, %cst_20 {dimension_numbers = #tpu.dot_dimension_numbers<[1], [0], [0], [1], [0, 0, 1, 1], [], []>} : vector<8x32xf32>, vector<32x16xf32>, vector<8x16xf32> -> vector<8x16xf32>
    %19 = vector.broadcast %9 : vector<1x16xf32> to vector<8x16xf32>
    %20 = arith.addf %18, %19 : vector<8x16xf32>
    %21 = math.tanh %20 : vector<8x16xf32>
    %cst_21 = arith.constant dense<0.000000e+00> : vector<8x16xf32>
    %22 = tpu.matmul %17, %11, %cst_21 {dimension_numbers = #tpu.dot_dimension_numbers<[1], [0], [0], [1], [0, 0, 1, 1], [], []>} : vector<8x32xf32>, vector<32x16xf32>, vector<8x16xf32> -> vector<8x16xf32>
    %23 = vector.broadcast %13 : vector<1x16xf32> to vector<8x16xf32>
    %24 = arith.addf %22, %23 : vector<8x16xf32>
    %25 = arith.subf %1, %24 : vector<8x16xf32>
    %cst_22 = arith.constant 0.000000e+00 : f32
    %26 = vector.broadcast %cst_22 : f32 to vector<8x16xf32>
    %27 = arith.subf %26, %21 : vector<8x16xf32>
    %28 = math.exp %27 : vector<8x16xf32>
    %29 = arith.mulf %25, %28 : vector<8x16xf32>
    %cst_23 = arith.constant dense<0.000000e+00> : vector<8xf32>
    %30 = vector.multi_reduction <add>, %21, %cst_23 [1] : vector<8x16xf32> to vector<8xf32>
    %cst_24 = arith.constant 0.000000e+00 : f32
    %31 = vector.broadcast %cst_24 : f32 to vector<8xf32>
    %32 = arith.subf %31, %30 : vector<8xf32>
    %c1 = arith.constant 1 : index
    %c0_25 = arith.constant 0 : index
    %c0_26 = arith.constant 0 : index
    %33 = vector.load %arg1[%c1, %c0_25, %c0_26] : memref<4x16x32xf32, #tpu.memory_space<vmem>>, vector<1x16x32xf32>
    %34 = vector.shape_cast %33 : vector<1x16x32xf32> to vector<16x32xf32>
    %c1_27 = arith.constant 1 : index
    %c0_28 = arith.constant 0 : index
    %c0_29 = arith.constant 0 : index
    %35 = vector.load %arg2[%c1_27, %c0_28, %c0_29] : memref<4x1x32xf32, #tpu.memory_space<vmem>>, vector<1x1x32xf32>
    %36 = vector.shape_cast %35 : vector<1x1x32xf32> to vector<1x32xf32>
    %c1_30 = arith.constant 1 : index
    %c0_31 = arith.constant 0 : index
    %c0_32 = arith.constant 0 : index
    %37 = vector.load %arg3[%c1_30, %c0_31, %c0_32] : memref<4x32x16xf32, #tpu.memory_space<vmem>>, vector<1x32x16xf32>
    %38 = vector.shape_cast %37 : vector<1x32x16xf32> to vector<32x16xf32>
    %c1_33 = arith.constant 1 : index
    %c0_34 = arith.constant 0 : index
    %c0_35 = arith.constant 0 : index
    %39 = vector.load %arg4[%c1_33, %c0_34, %c0_35] : memref<4x1x16xf32, #tpu.memory_space<vmem>>, vector<1x1x16xf32>
    %40 = vector.shape_cast %39 : vector<1x1x16xf32> to vector<1x16xf32>
    %c1_36 = arith.constant 1 : index
    %c0_37 = arith.constant 0 : index
    %c0_38 = arith.constant 0 : index
    %41 = vector.load %arg5[%c1_36, %c0_37, %c0_38] : memref<4x32x16xf32, #tpu.memory_space<vmem>>, vector<1x32x16xf32>
    %42 = vector.shape_cast %41 : vector<1x32x16xf32> to vector<32x16xf32>
    %c1_39 = arith.constant 1 : index
    %c0_40 = arith.constant 0 : index
    %c0_41 = arith.constant 0 : index
    %43 = vector.load %arg6[%c1_39, %c0_40, %c0_41] : memref<4x1x16xf32, #tpu.memory_space<vmem>>, vector<1x1x16xf32>
    %44 = vector.shape_cast %43 : vector<1x1x16xf32> to vector<1x16xf32>
    %cst_42 = arith.constant dense<0.000000e+00> : vector<8x32xf32>
    %45 = tpu.matmul %29, %34, %cst_42 {dimension_numbers = #tpu.dot_dimension_numbers<[1], [0], [0], [1], [0, 0, 1, 1], [], []>} : vector<8x16xf32>, vector<16x32xf32>, vector<8x32xf32> -> vector<8x32xf32>
    %46 = vector.broadcast %36 : vector<1x32xf32> to vector<8x32xf32>
    %47 = arith.addf %45, %46 : vector<8x32xf32>
    %48 = math.tanh %47 : vector<8x32xf32>
    %cst_43 = arith.constant dense<0.000000e+00> : vector<8x16xf32>
    %49 = tpu.matmul %48, %38, %cst_43 {dimension_numbers = #tpu.dot_dimension_numbers<[1], [0], [0], [1], [0, 0, 1, 1], [], []>} : vector<8x32xf32>, vector<32x16xf32>, vector<8x16xf32> -> vector<8x16xf32>
    %50 = vector.broadcast %40 : vector<1x16xf32> to vector<8x16xf32>
    %51 = arith.addf %49, %50 : vector<8x16xf32>
    %52 = math.tanh %51 : vector<8x16xf32>
    %cst_44 = arith.constant dense<0.000000e+00> : vector<8x16xf32>
    %53 = tpu.matmul %48, %42, %cst_44 {dimension_numbers = #tpu.dot_dimension_numbers<[1], [0], [0], [1], [0, 0, 1, 1], [], []>} : vector<8x32xf32>, vector<32x16xf32>, vector<8x16xf32> -> vector<8x16xf32>
    %54 = vector.broadcast %44 : vector<1x16xf32> to vector<8x16xf32>
    %55 = arith.addf %53, %54 : vector<8x16xf32>
    %56 = arith.subf %0, %55 : vector<8x16xf32>
    %cst_45 = arith.constant 0.000000e+00 : f32
    %57 = vector.broadcast %cst_45 : f32 to vector<8x16xf32>
    %58 = arith.subf %57, %52 : vector<8x16xf32>
    %59 = math.exp %58 : vector<8x16xf32>
    %60 = arith.mulf %56, %59 : vector<8x16xf32>
    %cst_46 = arith.constant dense<0.000000e+00> : vector<8xf32>
    %61 = vector.multi_reduction <add>, %52, %cst_46 [1] : vector<8x16xf32> to vector<8xf32>
    %cst_47 = arith.constant 0.000000e+00 : f32
    %62 = vector.broadcast %cst_47 : f32 to vector<8xf32>
    %63 = arith.subf %62, %61 : vector<8xf32>
    %c2 = arith.constant 2 : index
    %c0_48 = arith.constant 0 : index
    %c0_49 = arith.constant 0 : index
    %64 = vector.load %arg1[%c2, %c0_48, %c0_49] : memref<4x16x32xf32, #tpu.memory_space<vmem>>, vector<1x16x32xf32>
    %65 = vector.shape_cast %64 : vector<1x16x32xf32> to vector<16x32xf32>
    %c2_50 = arith.constant 2 : index
    %c0_51 = arith.constant 0 : index
    %c0_52 = arith.constant 0 : index
    %66 = vector.load %arg2[%c2_50, %c0_51, %c0_52] : memref<4x1x32xf32, #tpu.memory_space<vmem>>, vector<1x1x32xf32>
    %67 = vector.shape_cast %66 : vector<1x1x32xf32> to vector<1x32xf32>
    %c2_53 = arith.constant 2 : index
    %c0_54 = arith.constant 0 : index
    %c0_55 = arith.constant 0 : index
    %68 = vector.load %arg3[%c2_53, %c0_54, %c0_55] : memref<4x32x16xf32, #tpu.memory_space<vmem>>, vector<1x32x16xf32>
    %69 = vector.shape_cast %68 : vector<1x32x16xf32> to vector<32x16xf32>
    %c2_56 = arith.constant 2 : index
    %c0_57 = arith.constant 0 : index
    %c0_58 = arith.constant 0 : index
    %70 = vector.load %arg4[%c2_56, %c0_57, %c0_58] : memref<4x1x16xf32, #tpu.memory_space<vmem>>, vector<1x1x16xf32>
    %71 = vector.shape_cast %70 : vector<1x1x16xf32> to vector<1x16xf32>
    %c2_59 = arith.constant 2 : index
    %c0_60 = arith.constant 0 : index
    %c0_61 = arith.constant 0 : index
    %72 = vector.load %arg5[%c2_59, %c0_60, %c0_61] : memref<4x32x16xf32, #tpu.memory_space<vmem>>, vector<1x32x16xf32>
    %73 = vector.shape_cast %72 : vector<1x32x16xf32> to vector<32x16xf32>
    %c2_62 = arith.constant 2 : index
    %c0_63 = arith.constant 0 : index
    %c0_64 = arith.constant 0 : index
    %74 = vector.load %arg6[%c2_62, %c0_63, %c0_64] : memref<4x1x16xf32, #tpu.memory_space<vmem>>, vector<1x1x16xf32>
    %75 = vector.shape_cast %74 : vector<1x1x16xf32> to vector<1x16xf32>
    %cst_65 = arith.constant dense<0.000000e+00> : vector<8x32xf32>
    %76 = tpu.matmul %60, %65, %cst_65 {dimension_numbers = #tpu.dot_dimension_numbers<[1], [0], [0], [1], [0, 0, 1, 1], [], []>} : vector<8x16xf32>, vector<16x32xf32>, vector<8x32xf32> -> vector<8x32xf32>
    %77 = vector.broadcast %67 : vector<1x32xf32> to vector<8x32xf32>
    %78 = arith.addf %76, %77 : vector<8x32xf32>
    %79 = math.tanh %78 : vector<8x32xf32>
    %cst_66 = arith.constant dense<0.000000e+00> : vector<8x16xf32>
    %80 = tpu.matmul %79, %69, %cst_66 {dimension_numbers = #tpu.dot_dimension_numbers<[1], [0], [0], [1], [0, 0, 1, 1], [], []>} : vector<8x32xf32>, vector<32x16xf32>, vector<8x16xf32> -> vector<8x16xf32>
    %81 = vector.broadcast %71 : vector<1x16xf32> to vector<8x16xf32>
    %82 = arith.addf %80, %81 : vector<8x16xf32>
    %83 = math.tanh %82 : vector<8x16xf32>
    %cst_67 = arith.constant dense<0.000000e+00> : vector<8x16xf32>
    %84 = tpu.matmul %79, %73, %cst_67 {dimension_numbers = #tpu.dot_dimension_numbers<[1], [0], [0], [1], [0, 0, 1, 1], [], []>} : vector<8x32xf32>, vector<32x16xf32>, vector<8x16xf32> -> vector<8x16xf32>
    %85 = vector.broadcast %75 : vector<1x16xf32> to vector<8x16xf32>
    %86 = arith.addf %84, %85 : vector<8x16xf32>
    %87 = arith.subf %29, %86 : vector<8x16xf32>
    %cst_68 = arith.constant 0.000000e+00 : f32
    %88 = vector.broadcast %cst_68 : f32 to vector<8x16xf32>
    %89 = arith.subf %88, %83 : vector<8x16xf32>
    %90 = math.exp %89 : vector<8x16xf32>
    %91 = arith.mulf %87, %90 : vector<8x16xf32>
    %cst_69 = arith.constant dense<0.000000e+00> : vector<8xf32>
    %92 = vector.multi_reduction <add>, %83, %cst_69 [1] : vector<8x16xf32> to vector<8xf32>
    %cst_70 = arith.constant 0.000000e+00 : f32
    %93 = vector.broadcast %cst_70 : f32 to vector<8xf32>
    %94 = arith.subf %93, %92 : vector<8xf32>
    %c3 = arith.constant 3 : index
    %c0_71 = arith.constant 0 : index
    %c0_72 = arith.constant 0 : index
    %95 = vector.load %arg1[%c3, %c0_71, %c0_72] : memref<4x16x32xf32, #tpu.memory_space<vmem>>, vector<1x16x32xf32>
    %96 = vector.shape_cast %95 : vector<1x16x32xf32> to vector<16x32xf32>
    %c3_73 = arith.constant 3 : index
    %c0_74 = arith.constant 0 : index
    %c0_75 = arith.constant 0 : index
    %97 = vector.load %arg2[%c3_73, %c0_74, %c0_75] : memref<4x1x32xf32, #tpu.memory_space<vmem>>, vector<1x1x32xf32>
    %98 = vector.shape_cast %97 : vector<1x1x32xf32> to vector<1x32xf32>
    %c3_76 = arith.constant 3 : index
    %c0_77 = arith.constant 0 : index
    %c0_78 = arith.constant 0 : index
    %99 = vector.load %arg3[%c3_76, %c0_77, %c0_78] : memref<4x32x16xf32, #tpu.memory_space<vmem>>, vector<1x32x16xf32>
    %100 = vector.shape_cast %99 : vector<1x32x16xf32> to vector<32x16xf32>
    %c3_79 = arith.constant 3 : index
    %c0_80 = arith.constant 0 : index
    %c0_81 = arith.constant 0 : index
    %101 = vector.load %arg4[%c3_79, %c0_80, %c0_81] : memref<4x1x16xf32, #tpu.memory_space<vmem>>, vector<1x1x16xf32>
    %102 = vector.shape_cast %101 : vector<1x1x16xf32> to vector<1x16xf32>
    %c3_82 = arith.constant 3 : index
    %c0_83 = arith.constant 0 : index
    %c0_84 = arith.constant 0 : index
    %103 = vector.load %arg5[%c3_82, %c0_83, %c0_84] : memref<4x32x16xf32, #tpu.memory_space<vmem>>, vector<1x32x16xf32>
    %104 = vector.shape_cast %103 : vector<1x32x16xf32> to vector<32x16xf32>
    %c3_85 = arith.constant 3 : index
    %c0_86 = arith.constant 0 : index
    %c0_87 = arith.constant 0 : index
    %105 = vector.load %arg6[%c3_85, %c0_86, %c0_87] : memref<4x1x16xf32, #tpu.memory_space<vmem>>, vector<1x1x16xf32>
    %106 = vector.shape_cast %105 : vector<1x1x16xf32> to vector<1x16xf32>
    %cst_88 = arith.constant dense<0.000000e+00> : vector<8x32xf32>
    %107 = tpu.matmul %91, %96, %cst_88 {dimension_numbers = #tpu.dot_dimension_numbers<[1], [0], [0], [1], [0, 0, 1, 1], [], []>} : vector<8x16xf32>, vector<16x32xf32>, vector<8x32xf32> -> vector<8x32xf32>
    %108 = vector.broadcast %98 : vector<1x32xf32> to vector<8x32xf32>
    %109 = arith.addf %107, %108 : vector<8x32xf32>
    %110 = math.tanh %109 : vector<8x32xf32>
    %cst_89 = arith.constant dense<0.000000e+00> : vector<8x16xf32>
    %111 = tpu.matmul %110, %100, %cst_89 {dimension_numbers = #tpu.dot_dimension_numbers<[1], [0], [0], [1], [0, 0, 1, 1], [], []>} : vector<8x32xf32>, vector<32x16xf32>, vector<8x16xf32> -> vector<8x16xf32>
    %112 = vector.broadcast %102 : vector<1x16xf32> to vector<8x16xf32>
    %113 = arith.addf %111, %112 : vector<8x16xf32>
    %114 = math.tanh %113 : vector<8x16xf32>
    %cst_90 = arith.constant dense<0.000000e+00> : vector<8x16xf32>
    %115 = tpu.matmul %110, %104, %cst_90 {dimension_numbers = #tpu.dot_dimension_numbers<[1], [0], [0], [1], [0, 0, 1, 1], [], []>} : vector<8x32xf32>, vector<32x16xf32>, vector<8x16xf32> -> vector<8x16xf32>
    %116 = vector.broadcast %106 : vector<1x16xf32> to vector<8x16xf32>
    %117 = arith.addf %115, %116 : vector<8x16xf32>
    %118 = arith.subf %60, %117 : vector<8x16xf32>
    %cst_91 = arith.constant 0.000000e+00 : f32
    %119 = vector.broadcast %cst_91 : f32 to vector<8x16xf32>
    %120 = arith.subf %119, %114 : vector<8x16xf32>
    %121 = math.exp %120 : vector<8x16xf32>
    %122 = arith.mulf %118, %121 : vector<8x16xf32>
    %cst_92 = arith.constant dense<0.000000e+00> : vector<8xf32>
    %123 = vector.multi_reduction <add>, %114, %cst_92 [1] : vector<8x16xf32> to vector<8xf32>
    %cst_93 = arith.constant 0.000000e+00 : f32
    %124 = vector.broadcast %cst_93 : f32 to vector<8xf32>
    %125 = arith.subf %124, %123 : vector<8xf32>
    %126 = tpu.concatenate %122, %91 in 1 : vector<8x16xf32>, vector<8x16xf32> -> vector<8x32xf32>
    %c0_94 = arith.constant 0 : index
    %c0_95 = arith.constant 0 : index
    %127 = vector.load %arg7[%c0_94, %c0_95] : memref<8x32xf32, #tpu.memory_space<vmem>>, vector<8x32xf32>
    tpu.vector_store %arg7[%c0_94, %c0_95], %126 {strides = array<i32>} : memref<8x32xf32, #tpu.memory_space<vmem>>, vector<8x32xf32>,
    %128 = vector.shape_cast %32 : vector<8xf32> to vector<1x8xf32>
    %129 = vector.shape_cast %63 : vector<8xf32> to vector<1x8xf32>
    %130 = vector.shape_cast %94 : vector<8xf32> to vector<1x8xf32>
    %131 = vector.shape_cast %125 : vector<8xf32> to vector<1x8xf32>
    %132 = tpu.concatenate %128, %129, %130, %131 in 0 : vector<1x8xf32>, vector<1x8xf32>, vector<1x8xf32>, vector<1x8xf32> -> vector<4x8xf32>
    %c0_96 = arith.constant 0 : index
    %c0_97 = arith.constant 0 : index
    %133 = vector.load %arg8[%c0_96, %c0_97] : memref<4x8xf32, #tpu.memory_space<vmem>>, vector<4x8xf32>
    tpu.vector_store %arg8[%c0_96, %c0_97], %132 {strides = array<i32>} : memref<4x8xf32, #tpu.memory_space<vmem>>, vector<4x8xf32>,
    return
  }
}

</mosaic_0001>

<bundles_post_ra>
// kernel: normalizing_flow_forward.1
= control target key start
LH: loop header
LB: loop body
LE: loop exit
PB: predicated region body
PF: predicated region fallthrough
CT: control target
= control target key end

     0   :  { %14 = vsyncpa [#allocation3], 0  ;;  %v1537_v2 = vmov 0.0|0.0   ;;  %vm1538_vm0 = vmmov 0   ;;  %v1539_v4 = vmov 0.0   ;;  %s1861_s0 = inlined_call_operand.vmem [shape: f32[8,32], index: 0, kind: input, shape index: {}]   ;;  %s1862_s1 = inlined_call_operand.vmem [shape: f32[4,16,32], index: 1, kind: input, shape index: {}]   ;;  %s1863_s2 = inlined_call_operand.vmem [shape: f32[4,1,32], index: 2, kind: input, shape index: {}]   ;;  %s1864_s3 = inlined_call_operand.vmem [shape: f32[4,32,16], index: 3, kind: input, shape index: {}]   ;;  %s1865_s4 = inlined_call_operand.vmem [shape: f32[4,1,16], index: 4, kind: input, shape index: {}]   ;;  %s1866_s5 = inlined_call_operand.vmem [shape: f32[4,32,16], index: 5, kind: input, shape index: {}]   ;;  %s1867_s6 = inlined_call_operand.vmem [shape: f32[4,1,16], index: 6, kind: input, shape index: {}]   ;;  %s1868_s7 = inlined_call_operand.hbm [shape: f32[8,32], index: 7, kind: output, shape index: {0}]   ;;  %s1869_s8 = inlined_call_operand.hbm [shape: f32[4,8], index: 8, kind: output, shape index: {1}]  }
   0x1   :  { %v31_v0 = vld [vmem:[%s1862_s1] sm:$0xff]  ;;  %v32_v1 = vld [vmem:[%s1862_s1 + $0x8] sm:$0xff]  ;;  %1398 = vmatprep.subr.bf16.mxu0 %v1537_v2  ;;  %1286 = vmatprep.mubr.msk.f32.mxu0 %vm1538_vm0, %v1539_v4 }
   0x2   :  { %v1399_v3 = vpack.c.bf16 %v32_v1, %v31_v0 }
   0x3   :  { %15 = vsyncpa [#allocation5], 0  ;;  %1401 = vmatprep.subr.bf16.mxu1 %v1537_v2  ;;  %1297 = vmatprep.mubr.msk.f32.mxu1 %vm1538_vm0, %v1539_v4  ;;  %v1604_v5 = vld [vmem:[%s1861_s0] sm:$0xff]  ;;  %vm50_vm1 = vcmask 130048   ;;  %v35_v7 = vld [vmem:[%s1864_s3 + $0x8] sm:$0xff]  ;;  %vm131_vm2 = vcmask 261120  }
   0x4   :  { %1400 = vmatpush3.bf16.msra.mxu0 %v1399_v3  ;;  %v34_v6 = vld [vmem:[%s1864_s3] sm:$0xff]  ;;  %v40_v10 = vld [vmem:[%s1866_s5 + $0x8] sm:$0xff]  ;;  %v36_v11 = vld [vmem:[%s1864_s3 + $0x10] sm:$0xff]  ;;  %s1540_s10 = smov 16   ;;  %s1541_s15 = smov 112  }
   0x5   :  { %1407 = vmatprep.subr.bf16.mxu0 %v1537_v2  ;;  %v39_v8 = vld [vmem:[%s1866_s5] sm:$0xff]  ;;  %v1402_v9 = vpack.c.bf16 %v35_v7, %v34_v6  ;;  %v37_v12 = vld [vmem:[%s1864_s3 + $0x18] sm:$0xff]  ;;  %v41_v14 = vld [vmem:[%s1866_s5 + $0x10] sm:$0xff] }
   0x6   :  { %v1408_v13 = vpack.c.bf16 %v40_v10, %v39_v8  ;;  %v42_v15 = vld [vmem:[%s1866_s5 + $0x18] sm:$0xff]  ;;  %v1405_v16 = vpack.c.bf16 %v37_v12, %v36_v11  ;;  %v1167_v18 = vld [vmem:[%s1863_s2] ss:$0 sm:$0xff]  ;;  %v1173_v34 = vld [vmem:[%s1862_s1 + $0x10] sm:$0xff] }
   0x7   :  { %1287 = vmatmul.mubr.msk.f32.vlgmr.msra.gmra.mrb[0].mxu0 %vm50_vm1, %v1604_v5  ;;  %1403 = vmatpush3.bf16.msra.mxu1 %v1402_v9  ;;  %v1411_v17 = vpack.c.bf16 %v42_v15, %v41_v14  ;;  %v1169_v23 = vld [vmem:[%s1865_s4] ss:$0 sm:$0xff]  ;;  %v1174_v35 = vld [vmem:[%s1862_s1 + $0x18] sm:$0xff]  ;;  %v1177_v44 = vld [vmem:[%s1864_s3 + $0x28] sm:$0xff] }
   0x8   :  { %1308 = vmatprep.mubr.msk.f32.mxu0 %vm1538_vm0, %v1539_v4  ;;  %1409 = vmatpush3.bf16.msra.mxu0 %v1408_v13  ;;  %v1171_v24 = vld [vmem:[%s1867_s6] ss:$0 sm:$0xff]  ;;  %v1414_v36 = vpack.c.bf16 %v1174_v35, %v1173_v34  ;;  %v1182_v47 = vld [vmem:[%s1866_s5 + $0x28] sm:$0xff]  ;;  %v1178_v48 = vld [vmem:[%s1864_s3 + $0x30] sm:$0xff] }
   0x9   :  { %1404 = vmatprep.subr.bf16.mxu1 %v1537_v2  ;;  %1410 = vmatprep.subr.bf16.mxu0 %v1537_v2  ;;  %v1176_v43 = vld [vmem:[%s1864_s3 + $0x20] sm:$0xff]  ;;  %v1179_v49 = vld [vmem:[%s1864_s3 + $0x38] sm:$0xff]  ;;  %v1183_v51 = vld [vmem:[%s1866_s5 + $0x30] sm:$0xff] }
   0xa   :  { %v1181_v45 = vld [vmem:[%s1866_s5 + $0x20] sm:$0xff]  ;;  %v1417_v46 = vpack.c.bf16 %v1177_v44, %v1176_v43  ;;  %v1184_v52 = vld [vmem:[%s1866_s5 + $0x38] sm:$0xff]  ;;  %v1420_v53 = vpack.c.bf16 %v1179_v49, %v1178_v48  ;;  %v1193_v61 = vld [vmem:[%s1862_s1 + $0x28] sm:$0xff] }
   0xb   :  { %1406 = vmatpush3.bf16.msra.mxu1 %v1405_v16  ;;  %v1423_v50 = vpack.c.bf16 %v1182_v47, %v1181_v45  ;;  %v1426_v54 = vpack.c.bf16 %v1184_v52, %v1183_v51  ;;  %v1186_v55 = vld [vmem:[%s1863_s2 + $0x1] ss:$0 sm:$0xff]  ;;  %v1209_v34 = vld [vmem:[%s1867_s6 + $0x2] ss:$0 sm:$0xff]  ;;  %v1211_v48 = vld [vmem:[%s1862_s1 + $0x30] sm:$0xff] }
   0xc   :  { %1412 = vmatpush3.bf16.msra.mxu0 %v1411_v17  ;;  %1413 = vmatprep.subr.bf16.mxu1 %v1537_v2  ;;  %v1192_v60 = vld [vmem:[%s1862_s1 + $0x20] sm:$0xff]  ;;  %v1196_v17 = vld [vmem:[%s1864_s3 + $0x48] sm:$0xff]  ;;  %v1212_v49 = vld [vmem:[%s1862_s1 + $0x38] sm:$0xff] }
   0xd   :  { %1416 = vmatprep.subr.bf16.mxu0 %v1537_v2  ;;  %v1429_v62 = vpack.c.bf16 %v1193_v61, %v1192_v60  ;;  %v1188_v63 = vld [vmem:[%s1865_s4 + $0x1] ss:$0 sm:$0xff]  ;;  %v1217_v60 = vld [vmem:[%s1864_s3 + $0x78] sm:$0xff] }
   0xe   :  { %v1190_v11 = vld [vmem:[%s1867_s6 + $0x1] ss:$0 sm:$0xff] }
   0xf   :  { %v1195_v16 = vld [vmem:[%s1864_s3 + $0x40] sm:$0xff] }
  0xda   :  { %v120_v19 = vpop.f32.mrb[0].mxu0 }
  0xdb   :  { %v121_v20 = vadd.f32 %v1167_v18, %v120_v19  ;;  %v1288_v21 = vpop.f32.mrb[1].mxu0  ;;  %v1432_v18 = vpack.c.bf16 %v1196_v17, %v1195_v16  ;;  %v1201_v19 = vld [vmem:[%s1866_s5 + $0x48] sm:$0xff] }
  0xdc   :  { %v1198_v21 = vld [vmem:[%s1864_s3 + $0x58] sm:$0xff] }
  0xdd   :  { %1465 = vtanh.f32 %v121_v20  ;;  %v1197_v20 = vld [vmem:[%s1864_s3 + $0x50] sm:$0xff] }
  0xe7   :  { %v1466_v22 = vpop.eup %1465 }
  0xe8   :  { %1298 = vmatmul.mubr.msk.f32.vlgmr.msra.gmra.mrb[0].mxu1 %vm131_vm2, %v1466_v22  ;;  %1309 = vmatmul.mubr.msk.f32.vlgmr.msra.gmra.mrb[2].mxu0 %vm131_vm2, %v1466_v22 }
  0xe9   :  { %1315 = vmatprep.mubr.msk.f32.mxu1 %vm1538_vm0, %v1539_v4  ;;  %1326 = vmatprep.mubr.msk.f32.mxu0 %vm1538_vm0, %v1539_v4 }
  0xea   :  { %1415 = vmatpush3.bf16.msra.mxu1 %v1414_v36  ;;  %1418 = vmatpush3.bf16.msra.mxu0 %v1417_v46 }
  0xeb   :  { %1422 = vmatprep.subr.bf16.mxu1 %v1537_v2  ;;  %1419 = vmatprep.subr.bf16.mxu0 %v1537_v2 }
  0xee   :  { %1421 = vmatpush3.bf16.msra.mxu0 %v1420_v53 }
  0xef   :  { %1428 = vmatprep.subr.bf16.mxu0 %v1537_v2 }
 0x1bb   :  { %v201_v25 = vpop.f32.mrb[0].mxu1  ;;  %v278_v26 = vpop.f32.mrb[2].mxu0 }
 0x1bc   :  { %v202_v27 = vadd.f32 %v1169_v23, %v201_v25  ;;  %v279_v28 = vadd.f32 %v1171_v24, %v278_v26  ;;  %v1299_v29 = vpop.f32.mrb[1].mxu1  ;;  %v1310_v30 = vpop.f32.mrb[3].mxu0  ;;  %v1202_v23 = vld [vmem:[%s1866_s5 + $0x50] sm:$0xff]  ;;  %v1203_v24 = vld [vmem:[%s1866_s5 + $0x58] sm:$0xff]  ;;  %v1435_v25 = vpack.c.bf16 %v1198_v21, %v1197_v20 }
 0x1bd   :  { %v1441_v26 = vpack.c.bf16 %v1203_v24, %v1202_v23 }
 0x1be   :  { %1467 = vtanh.f32 %v202_v27  ;;  %283 = vrot.lane.b32.xlu0 %v279_v28, %s1540_s10  ;;  %v1205_v27 = vld [vmem:[%s1863_s2 + $0x2] ss:$0 sm:$0xff] }
 0x1c8   :  { %v1655_v31 = vpop.eup %1467 }
 0x1c9   :  { %v287_v32 = vsub.f32 0.0, %v1655_v31  ;;  %v295_v46 = vsel %vm50_vm1, %v1655_v31, 0.0 }
 0x1cb   :  { %v288_v33 = vmul.f32 1.442695, %v287_v32 }
 0x1cd   :  { %1469 = vpow2.f32 %v288_v33  ;;  %v1207_v33 = vld [vmem:[%s1865_s4 + $0x2] ss:$0 sm:$0xff] }
 0x1d7   :  { %v1470_v37 = vpop.eup %1469 }
 0x1d8   :  { %291 = vrot.lane.b32.xlu0 %v1470_v37, %s1540_s10 }
 0x230   :  { %v284_v38 = vpop.permute.xlu0 %283 }
 0x231   :  { %v286_v39 = vsub.f32 %v1604_v5, %v284_v38 }
 0x24a   :  { %v292_v40 = vpop.permute.xlu0 %291 }
 0x24b   :  { %v1667_v41 = vmul.f32 %v292_v40, %v286_v39 }
 0x24d   :  { %325 = vrot.lane.b32.xlu1 %v1667_v41, %s1541_s15 }
 0x2bf   :  { %v326_v42 = vpop.permute.xlu1 %325 }
 0x2c0   :  { %1316 = vmatmul.mubr.msk.f32.vlgmr.msra.gmra.mrb[2].mxu1 %vm50_vm1, %v326_v42 }
 0x2c1   :  { %1337 = vmatprep.mubr.msk.f32.mxu1 %vm1538_vm0, %v1539_v4  ;;  %1424 = vmatpush3.bf16.msra.mxu1 %v1423_v50  ;;  %v1444_v50 = vpack.c.bf16 %v1212_v49, %v1211_v48 }
 0x2c2   :  { %1425 = vmatprep.subr.bf16.mxu1 %v1537_v2 }
 0x2c5   :  { %1427 = vmatpush3.bf16.msra.mxu1 %v1426_v54 }
 0x2c6   :  { %1431 = vmatprep.subr.bf16.mxu1 %v1537_v2 }
 0x393   :  { %v395_v56 = vpop.f32.mrb[2].mxu1 }
 0x394   :  { %v396_v57 = vadd.f32 %v1186_v55, %v395_v56  ;;  %v1317_v58 = vpop.f32.mrb[3].mxu1  ;;  %v1214_v56 = vld [vmem:[%s1864_s3 + $0x60] sm:$0xff] }
 0x396   :  { %1471 = vtanh.f32 %v396_v57  ;;  %v1219_v57 = vld [vmem:[%s1866_s5 + $0x60] sm:$0xff] }
 0x3a0   :  { %v1472_v59 = vpop.eup %1471 }
 0x3a1   :  { %1327 = vmatmul.mubr.msk.f32.vlgmr.msra.gmra.mrb[4].mxu0 %vm131_vm2, %v1472_v59  ;;  %1338 = vmatmul.mubr.msk.f32.vlgmr.msra.gmra.mrb[4].mxu1 %vm131_vm2, %v1472_v59  ;;  %v1220_v59 = vld [vmem:[%s1866_s5 + $0x68] sm:$0xff] }
 0x3a2   :  { %1344 = vmatprep.mubr.msk.f32.mxu0 %vm1538_vm0, %v1539_v4  ;;  %1355 = vmatprep.mubr.msk.f32.mxu1 %vm1538_vm0, %v1539_v4  ;;  %v1453_v61 = vpack.c.bf16 %v1220_v59, %v1219_v57 }
 0x3a3   :  { %1430 = vmatpush3.bf16.msra.mxu0 %v1429_v62  ;;  %1433 = vmatpush3.bf16.msra.mxu1 %v1432_v18  ;;  %v1221_v62 = vld [vmem:[%s1866_s5 + $0x70] sm:$0xff] }
 0x3a4   :  { %1437 = vmatprep.subr.bf16.mxu0 %v1537_v2  ;;  %1434 = vmatprep.subr.bf16.mxu1 %v1537_v2 }
 0x3a7   :  { %1436 = vmatpush3.bf16.msra.mxu1 %v1435_v25 }
 0x3a8   :  { %1443 = vmatprep.subr.bf16.mxu1 %v1537_v2 }
 0x474   :  { %v475_v0 = vpop.f32.mrb[4].mxu0  ;;  %v552_v1 = vpop.f32.mrb[4].mxu1 }
 0x475   :  { %v476_v3 = vadd.f32 %v1188_v63, %v475_v0  ;;  %v1328_v6 = vpop.f32.mrb[5].mxu0  ;;  %v1339_v7 = vpop.f32.mrb[5].mxu1  ;;  %v553_v12 = vadd.f32 %v1190_v11, %v552_v1  ;;  %v1222_v63 = vld [vmem:[%s1866_s5 + $0x78] sm:$0xff] }
 0x476   :  { %v1456_v1 = vpack.c.bf16 %v1222_v63, %v1221_v62 }
 0x477   :  { %1473 = vtanh.f32 %v476_v3  ;;  %v556_v13 = vsub.f32 %v1604_v5, %v553_v12  ;;  %v1200_v5 = vld [vmem:[%s1866_s5 + $0x40] sm:$0xff] }
 0x478   :  { %v1438_v22 = vpack.c.bf16 %v1201_v19, %v1200_v5  ;;  %v1224_v3 = vld [vmem:[%s1863_s2 + $0x3] ss:$0 sm:$0xff] }
 0x479   :  { %v1228_v19 = vld [vmem:[%s1867_s6 + $0x3] ss:$0 sm:$0xff] }
 0x481   :  { %v1721_v8 = vpop.eup %1473 }
 0x482   :  { %v557_v9 = vsub.f32 0.0, %v1721_v8  ;;  %v561_v54 = vsel %vm50_vm1, %v1721_v8, 0.0 }
 0x484   :  { %v558_v10 = vmul.f32 1.442695, %v557_v9 }
 0x486   :  { %1475 = vpow2.f32 %v558_v10  ;;  %v1226_v10 = vld [vmem:[%s1865_s4 + $0x3] ss:$0 sm:$0xff]  ;;  %s1542_s4 = smov [#allocation2]  }
 0x487   :  { %s1145_s20 = sshll.u32 %s1542_s4, 4  ;;  %s1146_s20 = int_to_ptr.vmem [resolvable:$true] %s1145_s20 }
 0x488   :  { %s1489_s21 = scalar_lea.vmem %s1146_s20, 128  ;;  %p1494_p1 = scmp.lt.s32.totalorder %s1146_s20, %s1146_s20 }
 0x489   :  { %p1490_p0 = scmp.ne.s32.totalorder %s1146_s20, %s1489_s21  ;;  %p1495_p2 = scmp.lt.s32.totalorder %s1489_s21, %s1489_s21 }
 0x48b   :  { %p1496_p3 = por %p1495_p2, %p1494_p1 }
 0x48d   :  { %p1497_p4 = pnand %p1496_p3, %p1490_p0 }
 0x490   :  { %v1476_v14 = vpop.eup %1475 }
 0x491   :  { %v1728_v15 = vmul.f32 %v1476_v14, %v556_v13 }
 0x493   :  { %1345 = vmatmul.mubr.msk.f32.vlgmr.msra.gmra.mrb[6].mxu0 %vm50_vm1, %v1728_v15 }
 0x494   :  { %1366 = vmatprep.mubr.msk.f32.mxu0 %vm1538_vm0, %v1539_v4  ;;  %1439 = vmatpush3.bf16.msra.mxu0 %v1438_v22 }
 0x495   :  { %1440 = vmatprep.subr.bf16.mxu0 %v1537_v2 }
 0x498   :  { %1442 = vmatpush3.bf16.msra.mxu0 %v1441_v26 }
 0x499   :  { %1446 = vmatprep.subr.bf16.mxu0 %v1537_v2 }
 0x566   :  { %v659_v28 = vpop.f32.mrb[6].mxu0 }
 0x567   :  { %v660_v29 = vadd.f32 %v1205_v27, %v659_v28  ;;  %v1346_v30 = vpop.f32.mrb[7].mxu0 }
 0x569   :  { %1477 = vtanh.f32 %v660_v29 }
 0x573   :  { %v1478_v32 = vpop.eup %1477 }
 0x574   :  { %1356 = vmatmul.mubr.msk.f32.vlgmr.msra.gmra.mrb[6].mxu1 %vm131_vm2, %v1478_v32  ;;  %1367 = vmatmul.mubr.msk.f32.vlgmr.msra.gmra.mrb[8].mxu0 %vm131_vm2, %v1478_v32 }
 0x575   :  { %1373 = vmatprep.mubr.msk.f32.mxu1 %vm1538_vm0, %v1539_v4  ;;  %1384 = vmatprep.mubr.msk.f32.mxu0 %vm1538_vm0, %v1539_v4 }
 0x576   :  { %1445 = vmatpush3.bf16.msra.mxu1 %v1444_v50 }
 0x577   :  { %1452 = vmatprep.subr.bf16.mxu1 %v1537_v2 }
 0x647   :  { %v739_v35 = vpop.f32.mrb[6].mxu1  ;;  %v816_v36 = vpop.f32.mrb[8].mxu0 }
 0x648   :  { %v740_v37 = vadd.f32 %v1207_v33, %v739_v35  ;;  %v817_v38 = vadd.f32 %v1209_v34, %v816_v36  ;;  %v1357_v39 = vpop.f32.mrb[7].mxu1  ;;  %v1368_v40 = vpop.f32.mrb[9].mxu0 }
 0x64a   :  { %1479 = vtanh.f32 %v740_v37  ;;  %821 = vrot.lane.b32.xlu1 %v817_v38, %s1540_s10 }
 0x654   :  { %v1480_v42 = vpop.eup %1479 }
 0x655   :  { %v825_v43 = vsub.f32 0.0, %v1480_v42  ;;  %v833_v47 = vsel %vm50_vm1, %v1480_v42, 0.0 }
 0x657   :  { %v826_v44 = vmul.f32 1.442695, %v825_v43 }
 0x659   :  { %1481 = vpow2.f32 %v826_v44 }
 0x663   :  { %v1482_v45 = vpop.eup %1481 }
 0x664   :  { %829 = vrot.lane.b32.xlu0 %v1482_v45, %s1540_s10 }
 0x683   :  { %296 = vadd.xlane.f32.xlu0 %v295_v46 }
 0x687   :  { %834 = vadd.xlane.f32.xlu0 %v833_v47 }
 0x6bc   :  { %v822_v51 = vpop.permute.xlu1 %821 }
 0x6bd   :  { %v824_v52 = vsub.f32 %v1667_v41, %v822_v51  ;;  %v1215_v41 = vld [vmem:[%s1864_s3 + $0x68] sm:$0xff] }
 0x6be   :  { %v1447_v58 = vpack.c.bf16 %v1215_v41, %v1214_v56 }
 0x6c0   :  { %1448 = vmatpush3.bf16.msra.mxu0 %v1447_v58 }
 0x6c1   :  { %1449 = vmatprep.subr.bf16.mxu0 %v1537_v2 }
 0x6d6   :  { %v830_v31 = vpop.permute.xlu0 %829 }
 0x6d7   :  { %v832_v53 = vmul.f32 %v830_v31, %v824_v52 }
 0x6d9   :  { %863 = vrot.lane.b32.xlu1 %v832_v53, %s1541_s15 }
 0x6fd   :  { %562 = vadd.xlane.f32.xlu1 %v561_v54 }
 0x74b   :  { %v864_v55 = vpop.permute.xlu1 %863 }
 0x74c   :  { %1374 = vmatmul.mubr.msk.f32.vlgmr.msra.gmra.mrb[8].mxu1 %vm50_vm1, %v864_v55 }
 0x74d   :  { %1395 = vmatprep.mubr.msk.f32.mxu1 %vm1538_vm0, %v1539_v4  ;;  %v1216_v4 = vld [vmem:[%s1864_s3 + $0x70] sm:$0xff]  ;;  %1454 = vmatpush3.bf16.msra.mxu1 %v1453_v61 }
 0x74e   :  { %v1450_v0 = vpack.c.bf16 %v1217_v60, %v1216_v4  ;;  %1455 = vmatprep.subr.bf16.mxu1 %v1537_v2 }
 0x750   :  { %1451 = vmatpush3.bf16.msra.mxu0 %v1450_v0 }
 0x751   :  { %1457 = vmatpush3.bf16.msra.mxu1 %v1456_v1 }
 0x81f   :  { %v933_v6 = vpop.f32.mrb[8].mxu1 }
 0x820   :  { %v934_v7 = vadd.f32 %v1224_v3, %v933_v6  ;;  %v1375_v8 = vpop.f32.mrb[9].mxu1 }
 0x822   :  { %1483 = vtanh.f32 %v934_v7 }
 0x82c   :  { %v1484_v9 = vpop.eup %1483 }
 0x82d   :  { %1385 = vmatmul.mubr.msk.f32.vlgmr.msra.gmra.mrb[10].mxu0 %vm131_vm2, %v1484_v9  ;;  %1396 = vmatmul.mubr.msk.f32.vlgmr.msra.gmra.mrb[10].mxu1 %vm131_vm2, %v1484_v9 }
 0x900   :  { %v1013_v2 = vpop.f32.mrb[10].mxu0  ;;  %v1090_v11 = vpop.f32.mrb[10].mxu1 }
 0x901   :  { %v1014_v12 = vadd.f32 %v1226_v10, %v1013_v2  ;;  %v1386_v13 = vpop.f32.mrb[11].mxu0  ;;  %v1397_v14 = vpop.f32.mrb[11].mxu1  ;;  %v1091_v20 = vadd.f32 %v1228_v19, %v1090_v11 }
 0x903   :  { %1485 = vtanh.f32 %v1014_v12  ;;  %v1094_v21 = vsub.f32 %v1728_v15, %v1091_v20 }
 0x90d   :  { %v1486_v16 = vpop.eup %1485 }
 0x90e   :  { %v1095_v17 = vsub.f32 0.0, %v1486_v16  ;;  %v1099_v5 = vsel %vm50_vm1, %v1486_v16, 0.0 }
 0x90f   :  { %1100 = vadd.xlane.f32.xlu0 %v1099_v5 }
 0x910   :  { %v1096_v18 = vmul.f32 1.442695, %v1095_v17 }
 0x912   :  { %1487 = vpow2.f32 %v1096_v18 }
 0x91c   :  { %v1488_v22 = vpop.eup %1487 }
 0x91d   :  { %v1098_v23 = vmul.f32 %v1488_v22, %v1094_v21 }
 0x91f   :  { %v1103_v24 = vsel %vm50_vm1, %v1098_v23, %v832_v53 }
 0x920   :  { %1104 = vst.msk [vmem:[#allocation2] sm:$0xff] %vm131_vm2, %v1103_v24 }
 0x921   :  { %1500 = shalt.err (!%p1497_p4)
}
 0x922   :  { %s1501_s23 = scalar_lea.hbm %s1868_s7, 128 }
 0x923   :  { %p1502_p5 = scmp.ne.s32.totalorder %s1868_s7, %s1501_s23  ;;  %p1505_p6 = scmp.lt.u32.totalorder %s1501_s23, %s1868_s7 }
 0x925   :  { %p1507_p7 = pnand %p1505_p6, %p1502_p5 }
 0x927   :  { %1510 = shalt.err (!%p1507_p7)
}
 0x928   :  { %1148 = dma.vmem_to_hbm [thread:$0]  %s1146_s20, 128, %s1868_s7, [#allocation3]   ;;  %v1106_v15 = vlaneseq  ;;  %v297_v25 = vpop.xlane.xlu0 %296  ;;  %v563_v26 = vpop.xlane.xlu1 %562  ;;  %vm1131_vm3 = vcmask 1040384   ;;  %vm1133_vm4 = vcmask 1041408   ;;  %vm1135_vm5 = vcmask 1042432  }
 0x929   :  { %v564_v29 = vsub.f32 0.0, %v563_v26  ;;  %v298_v32 = vsub.f32 0.0, %v297_v25  ;;  %s1543_s15 = smov [#allocation4]   ;;  %vm1137_vm6 = vcmask 60416  }
 0x92a   :  { %v1107_v27 = vand.u32 127, %v1106_v15  ;;  %v1109_v28 = vshrl.u32 %v1106_v15, 7  ;;  %s1155_s28 = sshll.u32 %s1543_s15, 4  ;;  %s1156_s28 = int_to_ptr.vmem [resolvable:$true] %s1155_s28 }
 0x92b   :  { %s1511_s7 = scalar_lea.vmem %s1156_s28, 64  ;;  %p1516_p9 = scmp.lt.s32.totalorder %s1156_s28, %s1156_s28 }
 0x92c   :  { %v1110_v30 = vsub.s32 %v1107_v27, %v1109_v28  ;;  %v835_v33 = vpop.xlane.xlu0 %834  ;;  %p1512_p8 = scmp.ne.s32.totalorder %s1156_s28, %s1511_s7  ;;  %p1517_p10 = scmp.lt.s32.totalorder %s1511_s7, %s1511_s7 }
 0x92d   :  { %v836_v35 = vsub.f32 0.0, %v835_v33 }
 0x92e   :  { %v1117_v34 = vrot.slane %v564_v29, %v1110_v30  ;;  %v1111_v36 = vrot.slane %v298_v32, %v1110_v30  ;;  %p1518_p11 = por %p1517_p10, %p1516_p9 }
 0x92f   :  { %v1123_v40 = vrot.slane %v836_v35, %v1110_v30 }
 0x930   :  { %v1132_v38 = vsel %vm1131_vm3, %v1111_v36, %v1117_v34  ;;  %p1519_p12 = pnand %p1518_p11, %p1512_p8 }
 0x931   :  { %v1134_v43 = vsel %vm1133_vm4, %v1132_v38, %v1123_v40 }
 0x99c   :  { %v1101_v37 = vpop.xlane.xlu0 %1100 }
 0x99d   :  { %v1102_v39 = vsub.f32 0.0, %v1101_v37 }
 0x99f   :  { %v1129_v42 = vrot.slane %v1102_v39, %v1110_v30 }
 0x9a1   :  { %v1136_v44 = vsel %vm1135_vm5, %v1134_v43, %v1129_v42 }
 0x9a2   :  { %1138 = vst.msk [vmem:[#allocation4] sm:$0xf] %vm1137_vm6, %v1136_v44 }
 0x9a3   :  { %1522 = shalt.err (!%p1519_p12)
}
 0x9a4   :  { %s1523_s9 = scalar_lea.hbm %s1869_s8, 64 }
 0x9a5   :  { %p1524_p13 = scmp.ne.s32.totalorder %s1869_s8, %s1523_s9  ;;  %p1527_p0 = scmp.lt.u32.totalorder %s1523_s9, %s1869_s8 }
 0x9a7   :  { %p1529_p1 = pnand %p1527_p0, %p1524_p13 }
 0x9a9   :  { %1532 = shalt.err (!%p1529_p1)
}
 0x9aa   :  { %1158 = dma.vmem_to_hbm [thread:$0]  %s1156_s28, 64, %s1869_s8, [#allocation5]  }
 0x9ab   :  { %1533 = dma.done.wait [#allocation3], 128  }
 0x9ac   :  { %1534 = vsyncadd [#allocation3], 4294967168 }
 0x9ad   :  { %1535 = dma.done.wait [#allocation5], 64  }
 0x9ae   :  { %1536 = vsyncadd [#allocation5], 4294967232 }
 0x9af   :  { %1165 = vsyncpa [#allocation3], 1 }
 0x9b0   :  { %1166 = vsyncpa [#allocation5], 1 }

</bundles_post_ra>
